<compile_context>
chip_gen: v7x
topology: tpu7x:2x2x1
jax: 0.10.0
libtpu: 0.0.40
codegen_flags: <defaults>
</compile_context>

<pallas_src>
import math
import jax
import jax.numpy as jnp
from jax.experimental import pallas as pl
from jax.experimental.pallas import tpu as pltpu

# ---------------- config (small, consistent with the module) ----------------
S = 8            # sequence length
N = 2            # batch
E = 32           # d_model
NHEAD = 4
HEAD_DIM = E // NHEAD
DFF = 64         # dim_feedforward
EPS = 1e-5

T = S * N                    # 16 tokens total (seq-major flatten: t = s*N + n)
LANE_BLOCKS = 128 // E       # 4 tokens side-by-side per lane-dense output row
OUT_ROWS = T // LANE_BLOCKS  # 4


# ------------------------------ Pallas kernel -------------------------------
def encoder_layer_kernel(src_ref, pos_ref,
                         wqk_ref, wv_ref, wo_ref, w1_ref, w2_ref,
                         vecs_ref, out_ref):
    src = src_ref[...]                       # (T, E) float32
    qk_in = src + pos_ref[...]               # q = k input (src + pos)

    vecs = vecs_ref[...]                     # (8, 128) packed small params
    bqk = vecs[0:1, 0:2 * E]                 # [bq*scale | bk]
    bv  = vecs[1:2, 0:E]
    bo  = vecs[2:3, 0:E]
    b1  = vecs[3:4, 0:DFF]
    b2  = vecs[4:5, 0:E]
    g1  = vecs[5:6, 0:E]
    be1 = vecs[5:6, E:2 * E]
    g2  = vecs[6:7, 0:E]
    be2 = vecs[6:7, E:2 * E]

    # --- fused Q/K projection (q already scaled via the weights) + V ---------
    qk = jnp.dot(qk_in, wqk_ref[...], preferred_element_type=jnp.float32) + bqk  # (T, 2E)
    v  = jnp.dot(src,   wv_ref[...],  preferred_element_type=jnp.float32) + bv   # (T, E)

    # --- batch separation mask: token t belongs to batch (t % N) -------------
    rows = jax.lax.broadcasted_iota(jnp.int32, (T, T), 0)
    cols = jax.lax.broadcasted_iota(jnp.int32, (T, T), 1)
    same_batch = (rows % N) == (cols % N)
    neg_big = jnp.float32(-1e30)

    wo = wo_ref[...]                         # (E, E) in (in, out) layout
    attn = jnp.zeros((T, E), jnp.float32)
    for h in range(NHEAD):                   # static unroll over 4 heads
        lo = h * HEAD_DIM
        qh = qk[:, lo:lo + HEAD_DIM]                 # (T, hd), pre-scaled
        kh = qk[:, E + lo:E + lo + HEAD_DIM]         # (T, hd)
        vh = v[:, lo:lo + HEAD_DIM]                  # (T, hd)

        s = jnp.dot(qh, kh.T, preferred_element_type=jnp.float32)   # (T, T)
        s = jnp.where(same_batch, s, neg_big)        # kill cross-batch terms
        s = s - jnp.max(s, axis=-1, keepdims=True)
        e = jnp.exp(s)
        inv = pl.reciprocal(jnp.sum(e, axis=-1, keepdims=True), approx=False)
        p = e * inv                                  # softmax probabilities

        ctx = jnp.dot(p, vh, preferred_element_type=jnp.float32)    # (T, hd)
        # fold head context directly into the output projection:
        # concat(ctx_h) @ Wo == sum_h ctx_h @ Wo[h*hd:(h+1)*hd, :]
        attn = attn + jnp.dot(ctx, wo[lo:lo + HEAD_DIM, :],
                              preferred_element_type=jnp.float32)
    attn = attn + bo

    # --- residual + LayerNorm1 -----------------------------------------------
    x = src + attn
    mu = jnp.mean(x, axis=-1, keepdims=True)
    xc = x - mu
    var = jnp.mean(xc * xc, axis=-1, keepdims=True)
    x = xc * jax.lax.rsqrt(var + EPS) * g1 + be1

    # --- feed-forward (dropout = identity in eval) ---------------------------
    h1 = jnp.dot(x, w1_ref[...], preferred_element_type=jnp.float32) + b1
    h1 = jnp.maximum(h1, 0.0)
    ffn = jnp.dot(h1, w2_ref[...], preferred_element_type=jnp.float32) + b2

    # --- residual + LayerNorm2 -----------------------------------------------
    y = x + ffn
    mu = jnp.mean(y, axis=-1, keepdims=True)
    yc = y - mu
    var = jnp.mean(yc * yc, axis=-1, keepdims=True)
    y = yc * jax.lax.rsqrt(var + EPS) * g2 + be2     # (T, E)

    # --- lane-dense output: pack 4 blocks of 4 tokens side-by-side -----------
    # out[i, j*E:(j+1)*E] = y[j*OUT_ROWS + i]  (un-interleaved in the wrapper)
    out_ref[...] = jnp.concatenate(
        [y[j * OUT_ROWS:(j + 1) * OUT_ROWS, :] for j in range(LANE_BLOCKS)],
        axis=1).astype(out_ref.dtype)


# ---------------------- one-time parameter preparation ----------------------
def prepare_params(p):
    """Transpose / fuse / pack the module parameters. Run ONCE, outside jit."""
    scale = 1.0 / math.sqrt(HEAD_DIM)
    wqk = jnp.concatenate([p["wq"].T * scale, p["wk"].T], axis=1)   # (E, 2E)
    wv = p["wv"].T                                                  # (E, E)
    wo = p["wo"].T                                                  # (E, E)
    w1 = p["w1"].T                                                  # (E, DFF)
    w2 = p["w2"].T                                                  # (DFF, E)

    vecs = jnp.zeros((8, 128), jnp.float32)
    vecs = vecs.at[0, 0:E].set(p["bq"] * scale)
    vecs = vecs.at[0, E:2 * E].set(p["bk"])
    vecs = vecs.at[1, 0:E].set(p["bv"])
    vecs = vecs.at[2, 0:E].set(p["bo"])
    vecs = vecs.at[3, 0:DFF].set(p["b1"])
    vecs = vecs.at[4, 0:E].set(p["b2"])
    vecs = vecs.at[5, 0:E].set(p["g1"])
    vecs = vecs.at[5, E:2 * E].set(p["be1"])
    vecs = vecs.at[6, 0:E].set(p["g2"])
    vecs = vecs.at[6, E:2 * E].set(p["be2"])
    return {"wqk": wqk, "wv": wv, "wo": wo, "w1": w1, "w2": w2, "vecs": vecs}


# -------------------------------- wrapper ------------------------------------
@jax.jit
def transformer_encoder_layer(src, pos, prm):
    """src, pos: (S, N, E) float32.  prm: output of prepare_params.
    Returns (S, N, E)."""
    # seq-major flatten is a free reshape (no transpose): row t = (s, n)
    src2d = src.reshape(T, E)
    pos2d = pos.reshape(T, E)

    vmem = pltpu.MemorySpace.VMEM
    out = pl.pallas_call(
        encoder_layer_kernel,
        out_shape=jax.ShapeDtypeStruct((OUT_ROWS, 128), jnp.float32),
        in_specs=[pl.BlockSpec(memory_space=vmem)] * 8,
        out_specs=pl.BlockSpec(memory_space=vmem),
    )(src2d, pos2d, prm["wqk"], prm["wv"], prm["wo"], prm["w1"], prm["w2"],
      prm["vecs"])

    # undo the lane-dense interleave: out[i, j] (blocks of E) holds token 4j+i
    y = out.reshape(OUT_ROWS, LANE_BLOCKS, E).transpose(1, 0, 2).reshape(T, E)
    return y.reshape(S, N, E)


# --------------------------- pure-JAX reference -------------------------------
def reference_forward(src, pos, p):
    qk = src + pos                                     # (S, N, E)
    q = jnp.einsum("snd,ed->sne", qk, p["wq"]) + p["bq"]
    k = jnp.einsum("snd,ed->sne", qk, p["wk"]) + p["bk"]
    v = jnp.einsum("snd,ed->sne", src, p["wv"]) + p["bv"]

    def split(x):  # (S, N, E) -> (N, H, S, hd)
        return jnp.transpose(x.reshape(S, N, NHEAD, HEAD_DIM), (1, 2, 0, 3))

    qh, kh, vh = split(q), split(k), split(v)
    scores = jnp.einsum("nhqd,nhkd->nhqk", qh, kh) / math.sqrt(HEAD_DIM)
    pattn = jax.nn.softmax(scores, axis=-1)
    ctx = jnp.einsum("nhqk,nhkd->nhqd", pattn, vh)      # (N, H, S, hd)
    ctx = jnp.transpose(ctx, (2, 0, 1, 3)).reshape(S, N, E)
    attn_out = jnp.einsum("snd,ed->sne", ctx, p["wo"]) + p["bo"]

    def layernorm(x, g, b):
        mu = jnp.mean(x, axis=-1, keepdims=True)
        var = jnp.mean((x - mu) ** 2, axis=-1, keepdims=True)
        return (x - mu) / jnp.sqrt(var + EPS) * g + b

    x = layernorm(src + attn_out, p["g1"], p["be1"])
    h1 = jax.nn.relu(jnp.einsum("snd,fd->snf", x, p["w1"]) + p["b1"])
    ffn = jnp.einsum("snf,ef->sne", h1, p["w2"]) + p["b2"]
    return layernorm(x + ffn, p["g2"], p["be2"])


# ---------------------------------- main --------------------------------------
if __name__ == "__main__":
    key = jax.random.PRNGKey(0)
    keys = jax.random.split(key, 12)

    # Deterministic synthetic parameters (PyTorch Linear convention: (out, in)).
    in_proj_w = 0.05 * jax.random.normal(keys[0], (3 * E, E), jnp.float32)
    in_proj_b = 0.05 * jax.random.normal(keys[1], (3 * E,), jnp.float32)
    params = {
        "wq": in_proj_w[:E], "wk": in_proj_w[E:2 * E], "wv": in_proj_w[2 * E:],
        "bq": in_proj_b[:E], "bk": in_proj_b[E:2 * E], "bv": in_proj_b[2 * E:],
        "wo": 0.05 * jax.random.normal(keys[2], (E, E), jnp.float32),
        "bo": 0.05 * jax.random.normal(keys[3], (E,), jnp.float32),
        "w1": 0.05 * jax.random.normal(keys[4], (DFF, E), jnp.float32),
        "b1": 0.05 * jax.random.normal(keys[5], (DFF,), jnp.float32),
        "w2": 0.05 * jax.random.normal(keys[6], (E, DFF), jnp.float32),
        "b2": 0.05 * jax.random.normal(keys[7], (E,), jnp.float32),
        "g1": jnp.ones((E,), jnp.float32),
        "be1": jnp.zeros((E,), jnp.float32),
        "g2": jnp.ones((E,), jnp.float32),
        "be2": jnp.zeros((E,), jnp.float32),
    }

    src = jax.random.normal(keys[8], (S, N, E), jnp.float32)
    pos = jax.random.normal(keys[9], (S, N, E), jnp.float32)

    prepared = prepare_params(params)          # one-time, outside jit

    out = transformer_encoder_layer(src, pos, prepared)
    out = jax.block_until_ready(out)

    ref = reference_forward(src, pos, params)
    assert out.shape == (S, N, E)
    assert jnp.allclose(out, ref, atol=1e-4, rtol=1e-4), (
        f"max abs err = {jnp.max(jnp.abs(out - ref))}")

    print("KERNEL_OK")
</pallas_src>

<mosaic_0001>
module attributes {stable_mosaic.version = 11 : i64} {
  func.func @encoder_layer_kernel(%arg0: memref<16x32xf32, #tpu.memory_space<vmem>>, %arg1: memref<16x32xf32, #tpu.memory_space<vmem>>, %arg2: memref<32x64xf32, #tpu.memory_space<vmem>>, %arg3: memref<32x32xf32, #tpu.memory_space<vmem>>, %arg4: memref<32x32xf32, #tpu.memory_space<vmem>>, %arg5: memref<32x64xf32, #tpu.memory_space<vmem>>, %arg6: memref<64x32xf32, #tpu.memory_space<vmem>>, %arg7: memref<8x128xf32, #tpu.memory_space<vmem>>, %arg8: memref<4x128xf32, #tpu.memory_space<vmem>>) attributes {dimension_semantics = [], scalar_prefetch = 0 : i64, scratch_operands = 0 : i64, tpu.core_type = #tpu.core_type<tc>} {
    %c0 = arith.constant 0 : index
    %c0_0 = arith.constant 0 : index
    %0 = vector.load %arg0[%c0, %c0_0] : memref<16x32xf32, #tpu.memory_space<vmem>>, vector<16x32xf32>
    %c0_1 = arith.constant 0 : index
    %c0_2 = arith.constant 0 : index
    %1 = vector.load %arg1[%c0_1, %c0_2] : memref<16x32xf32, #tpu.memory_space<vmem>>, vector<16x32xf32>
    %2 = arith.addf %0, %1 : vector<16x32xf32>
    %c0_3 = arith.constant 0 : index
    %c0_4 = arith.constant 0 : index
    %3 = vector.load %arg7[%c0_3, %c0_4] : memref<8x128xf32, #tpu.memory_space<vmem>>, vector<8x128xf32>
    %4 = vector.extract_strided_slice %3 {offsets = [0, 0], sizes = [1, 64], strides = [1, 1]} : vector<8x128xf32> to vector<1x64xf32>
    %5 = vector.extract_strided_slice %3 {offsets = [1, 0], sizes = [1, 32], strides = [1, 1]} : vector<8x128xf32> to vector<1x32xf32>
    %6 = vector.extract_strided_slice %3 {offsets = [2, 0], sizes = [1, 32], strides = [1, 1]} : vector<8x128xf32> to vector<1x32xf32>
    %7 = vector.extract_strided_slice %3 {offsets = [3, 0], sizes = [1, 64], strides = [1, 1]} : vector<8x128xf32> to vector<1x64xf32>
    %8 = vector.extract_strided_slice %3 {offsets = [4, 0], sizes = [1, 32], strides = [1, 1]} : vector<8x128xf32> to vector<1x32xf32>
    %9 = vector.extract_strided_slice %3 {offsets = [5, 0], sizes = [1, 32], strides = [1, 1]} : vector<8x128xf32> to vector<1x32xf32>
    %10 = vector.extract_strided_slice %3 {offsets = [5, 32], sizes = [1, 32], strides = [1, 1]} : vector<8x128xf32> to vector<1x32xf32>
    %11 = vector.extract_strided_slice %3 {offsets = [6, 0], sizes = [1, 32], strides = [1, 1]} : vector<8x128xf32> to vector<1x32xf32>
    %12 = vector.extract_strided_slice %3 {offsets = [6, 32], sizes = [1, 32], strides = [1, 1]} : vector<8x128xf32> to vector<1x32xf32>
    %c0_5 = arith.constant 0 : index
    %c0_6 = arith.constant 0 : index
    %13 = vector.load %arg2[%c0_5, %c0_6] : memref<32x64xf32, #tpu.memory_space<vmem>>, vector<32x64xf32>
    %cst = arith.constant dense<0.000000e+00> : vector<16x64xf32>
    %14 = tpu.matmul %2, %13, %cst {dimension_numbers = #tpu.dot_dimension_numbers<[1], [0], [0], [1], [0, 0, 1, 1], [], []>} : vector<16x32xf32>, vector<32x64xf32>, vector<16x64xf32> -> vector<16x64xf32>
    %15 = vector.broadcast %4 : vector<1x64xf32> to vector<16x64xf32>
    %16 = arith.addf %14, %15 : vector<16x64xf32>
    %c0_7 = arith.constant 0 : index
    %c0_8 = arith.constant 0 : index
    %17 = vector.load %arg3[%c0_7, %c0_8] : memref<32x32xf32, #tpu.memory_space<vmem>>, vector<32x32xf32>
    %cst_9 = arith.constant dense<0.000000e+00> : vector<16x32xf32>
    %18 = tpu.matmul %0, %17, %cst_9 {dimension_numbers = #tpu.dot_dimension_numbers<[1], [0], [0], [1], [0, 0, 1, 1], [], []>} : vector<16x32xf32>, vector<32x32xf32>, vector<16x32xf32> -> vector<16x32xf32>
    %19 = vector.broadcast %5 : vector<1x32xf32> to vector<16x32xf32>
    %20 = arith.addf %18, %19 : vector<16x32xf32>
    %21 = tpu.iota {dimensions = array<i32: 0>} : vector<16x16xi32>
    %22 = tpu.iota {dimensions = array<i32: 1>} : vector<16x16xi32>
    %c2_i32 = arith.constant 2 : i32
    %c0_i32 = arith.constant 0 : i32
    %23 = arith.cmpi eq, %c2_i32, %c0_i32 : i32
    %c1_i32 = arith.constant 1 : i32
    %24 = arith.select %23, %c1_i32, %c2_i32 : i32
    %25 = vector.broadcast %24 : i32 to vector<16x16xi32>
    %26 = arith.remsi %21, %25 : vector<16x16xi32>
    %c0_i32_10 = arith.constant 0 : i32
    %27 = vector.broadcast %c0_i32_10 : i32 to vector<16x16xi32>
    %28 = arith.cmpi ne, %26, %27 : vector<16x16xi32>
    %c0_i32_11 = arith.constant 0 : i32
    %29 = vector.broadcast %c0_i32_11 : i32 to vector<16x16xi32>
    %30 = arith.cmpi slt, %26, %29 : vector<16x16xi32>
    %c0_i32_12 = arith.constant 0 : i32
    %31 = arith.cmpi slt, %24, %c0_i32_12 : i32
    %32 = vector.broadcast %31 : i1 to vector<16x16xi1>
    %33 = vector.broadcast %32 : vector<16x16xi1> to vector<16x16xi1>
    %34 = arith.xori %30, %33 : vector<16x16xi1>
    %35 = arith.andi %34, %28 : vector<16x16xi1>
    %36 = vector.broadcast %24 : i32 to vector<16x16xi32>
    %37 = arith.addi %26, %36 : vector<16x16xi32>
    %38 = arith.select %35, %37, %26 : vector<16x16xi1>, vector<16x16xi32>
    %c2_i32_13 = arith.constant 2 : i32
    %c0_i32_14 = arith.constant 0 : i32
    %39 = arith.cmpi eq, %c2_i32_13, %c0_i32_14 : i32
    %c1_i32_15 = arith.constant 1 : i32
    %40 = arith.select %39, %c1_i32_15, %c2_i32_13 : i32
    %41 = vector.broadcast %40 : i32 to vector<16x16xi32>
    %42 = arith.remsi %22, %41 : vector<16x16xi32>
    %c0_i32_16 = arith.constant 0 : i32
    %43 = vector.broadcast %c0_i32_16 : i32 to vector<16x16xi32>
    %44 = arith.cmpi ne, %42, %43 : vector<16x16xi32>
    %c0_i32_17 = arith.constant 0 : i32
    %45 = vector.broadcast %c0_i32_17 : i32 to vector<16x16xi32>
    %46 = arith.cmpi slt, %42, %45 : vector<16x16xi32>
    %c0_i32_18 = arith.constant 0 : i32
    %47 = arith.cmpi slt, %40, %c0_i32_18 : i32
    %48 = vector.broadcast %47 : i1 to vector<16x16xi1>
    %49 = vector.broadcast %48 : vector<16x16xi1> to vector<16x16xi1>
    %50 = arith.xori %46, %49 : vector<16x16xi1>
    %51 = arith.andi %50, %44 : vector<16x16xi1>
    %52 = vector.broadcast %40 : i32 to vector<16x16xi32>
    %53 = arith.addi %42, %52 : vector<16x16xi32>
    %54 = arith.select %51, %53, %42 : vector<16x16xi1>, vector<16x16xi32>
    %55 = arith.cmpi eq, %38, %54 : vector<16x16xi32>
    %c0_19 = arith.constant 0 : index
    %c0_20 = arith.constant 0 : index
    %56 = vector.load %arg4[%c0_19, %c0_20] : memref<32x32xf32, #tpu.memory_space<vmem>>, vector<32x32xf32>
    %cst_21 = arith.constant 0.000000e+00 : f32
    %57 = vector.broadcast %cst_21 : f32 to vector<16x32xf32>
    %58 = vector.extract_strided_slice %16 {offsets = [0, 0], sizes = [16, 8], strides = [1, 1]} : vector<16x64xf32> to vector<16x8xf32>
    %59 = vector.extract_strided_slice %16 {offsets = [0, 32], sizes = [16, 8], strides = [1, 1]} : vector<16x64xf32> to vector<16x8xf32>
    %60 = vector.extract_strided_slice %20 {offsets = [0, 0], sizes = [16, 8], strides = [1, 1]} : vector<16x32xf32> to vector<16x8xf32>
    %61 = tpu.transpose %59, [1, 0] : vector<16x8xf32> -> vector<8x16xf32>
    %cst_22 = arith.constant dense<0.000000e+00> : vector<16x16xf32>
    %62 = tpu.matmul %58, %61, %cst_22 {dimension_numbers = #tpu.dot_dimension_numbers<[1], [0], [0], [1], [0, 0, 1, 1], [], []>} : vector<16x8xf32>, vector<8x16xf32>, vector<16x16xf32> -> vector<16x16xf32>
    %cst_23 = arith.constant -1.000000e+30 : f32
    %63 = vector.broadcast %cst_23 : f32 to vector<16x16xf32>
    %64 = arith.select %55, %62, %63 : vector<16x16xi1>, vector<16x16xf32>
    %cst_24 = arith.constant dense<0xFF800000> : vector<16xf32>
    %65 = vector.multi_reduction <maximumf>, %64, %cst_24 [1] : vector<16x16xf32> to vector<16xf32>
    %66 = vector.shape_cast %65 : vector<16xf32> to vector<16x1xf32>
    %67 = vector.broadcast %66 : vector<16x1xf32> to vector<16x16xf32>
    %68 = arith.subf %64, %67 : vector<16x16xf32>
    %69 = math.exp %68 : vector<16x16xf32>
    %cst_25 = arith.constant dense<0.000000e+00> : vector<16xf32>
    %70 = vector.multi_reduction <add>, %69, %cst_25 [1] : vector<16x16xf32> to vector<16xf32>
    %71 = vector.shape_cast %70 : vector<16xf32> to vector<16x1xf32>
    %72 = tpu.reciprocal %71 : vector<16x1xf32> -> vector<16x1xf32>
    %73 = vector.broadcast %72 : vector<16x1xf32> to vector<16x16xf32>
    %74 = arith.mulf %69, %73 : vector<16x16xf32>
    %cst_26 = arith.constant dense<0.000000e+00> : vector<16x8xf32>
    %75 = tpu.matmul %74, %60, %cst_26 {dimension_numbers = #tpu.dot_dimension_numbers<[1], [0], [0], [1], [0, 0, 1, 1], [], []>} : vector<16x16xf32>, vector<16x8xf32>, vector<16x8xf32> -> vector<16x8xf32>
    %76 = vector.extract_strided_slice %56 {offsets = [0, 0], sizes = [8, 32], strides = [1, 1]} : vector<32x32xf32> to vector<8x32xf32>
    %cst_27 = arith.constant dense<0.000000e+00> : vector<16x32xf32>
    %77 = tpu.matmul %75, %76, %cst_27 {dimension_numbers = #tpu.dot_dimension_numbers<[1], [0], [0], [1], [0, 0, 1, 1], [], []>} : vector<16x8xf32>, vector<8x32xf32>, vector<16x32xf32> -> vector<16x32xf32>
    %78 = arith.addf %57, %77 : vector<16x32xf32>
    %79 = vector.extract_strided_slice %16 {offsets = [0, 8], sizes = [16, 8], strides = [1, 1]} : vector<16x64xf32> to vector<16x8xf32>
    %80 = vector.extract_strided_slice %16 {offsets = [0, 40], sizes = [16, 8], strides = [1, 1]} : vector<16x64xf32> to vector<16x8xf32>
    %81 = vector.extract_strided_slice %20 {offsets = [0, 8], sizes = [16, 8], strides = [1, 1]} : vector<16x32xf32> to vector<16x8xf32>
    %82 = tpu.transpose %80, [1, 0] : vector<16x8xf32> -> vector<8x16xf32>
    %cst_28 = arith.constant dense<0.000000e+00> : vector<16x16xf32>
    %83 = tpu.matmul %79, %82, %cst_28 {dimension_numbers = #tpu.dot_dimension_numbers<[1], [0], [0], [1], [0, 0, 1, 1], [], []>} : vector<16x8xf32>, vector<8x16xf32>, vector<16x16xf32> -> vector<16x16xf32>
    %cst_29 = arith.constant -1.000000e+30 : f32
    %84 = vector.broadcast %cst_29 : f32 to vector<16x16xf32>
    %85 = arith.select %55, %83, %84 : vector<16x16xi1>, vector<16x16xf32>
    %cst_30 = arith.constant dense<0xFF800000> : vector<16xf32>
    %86 = vector.multi_reduction <maximumf>, %85, %cst_30 [1] : vector<16x16xf32> to vector<16xf32>
    %87 = vector.shape_cast %86 : vector<16xf32> to vector<16x1xf32>
    %88 = vector.broadcast %87 : vector<16x1xf32> to vector<16x16xf32>
    %89 = arith.subf %85, %88 : vector<16x16xf32>
    %90 = math.exp %89 : vector<16x16xf32>
    %cst_31 = arith.constant dense<0.000000e+00> : vector<16xf32>
    %91 = vector.multi_reduction <add>, %90, %cst_31 [1] : vector<16x16xf32> to vector<16xf32>
    %92 = vector.shape_cast %91 : vector<16xf32> to vector<16x1xf32>
    %93 = tpu.reciprocal %92 : vector<16x1xf32> -> vector<16x1xf32>
    %94 = vector.broadcast %93 : vector<16x1xf32> to vector<16x16xf32>
    %95 = arith.mulf %90, %94 : vector<16x16xf32>
    %cst_32 = arith.constant dense<0.000000e+00> : vector<16x8xf32>
    %96 = tpu.matmul %95, %81, %cst_32 {dimension_numbers = #tpu.dot_dimension_numbers<[1], [0], [0], [1], [0, 0, 1, 1], [], []>} : vector<16x16xf32>, vector<16x8xf32>, vector<16x8xf32> -> vector<16x8xf32>
    %97 = vector.extract_strided_slice %56 {offsets = [8, 0], sizes = [8, 32], strides = [1, 1]} : vector<32x32xf32> to vector<8x32xf32>
    %cst_33 = arith.constant dense<0.000000e+00> : vector<16x32xf32>
    %98 = tpu.matmul %96, %97, %cst_33 {dimension_numbers = #tpu.dot_dimension_numbers<[1], [0], [0], [1], [0, 0, 1, 1], [], []>} : vector<16x8xf32>, vector<8x32xf32>, vector<16x32xf32> -> vector<16x32xf32>
    %99 = arith.addf %78, %98 : vector<16x32xf32>
    %100 = vector.extract_strided_slice %16 {offsets = [0, 16], sizes = [16, 8], strides = [1, 1]} : vector<16x64xf32> to vector<16x8xf32>
    %101 = vector.extract_strided_slice %16 {offsets = [0, 48], sizes = [16, 8], strides = [1, 1]} : vector<16x64xf32> to vector<16x8xf32>
    %102 = vector.extract_strided_slice %20 {offsets = [0, 16], sizes = [16, 8], strides = [1, 1]} : vector<16x32xf32> to vector<16x8xf32>
    %103 = tpu.transpose %101, [1, 0] : vector<16x8xf32> -> vector<8x16xf32>
    %cst_34 = arith.constant dense<0.000000e+00> : vector<16x16xf32>
    %104 = tpu.matmul %100, %103, %cst_34 {dimension_numbers = #tpu.dot_dimension_numbers<[1], [0], [0], [1], [0, 0, 1, 1], [], []>} : vector<16x8xf32>, vector<8x16xf32>, vector<16x16xf32> -> vector<16x16xf32>
    %cst_35 = arith.constant -1.000000e+30 : f32
    %105 = vector.broadcast %cst_35 : f32 to vector<16x16xf32>
    %106 = arith.select %55, %104, %105 : vector<16x16xi1>, vector<16x16xf32>
    %cst_36 = arith.constant dense<0xFF800000> : vector<16xf32>
    %107 = vector.multi_reduction <maximumf>, %106, %cst_36 [1] : vector<16x16xf32> to vector<16xf32>
    %108 = vector.shape_cast %107 : vector<16xf32> to vector<16x1xf32>
    %109 = vector.broadcast %108 : vector<16x1xf32> to vector<16x16xf32>
    %110 = arith.subf %106, %109 : vector<16x16xf32>
    %111 = math.exp %110 : vector<16x16xf32>
    %cst_37 = arith.constant dense<0.000000e+00> : vector<16xf32>
    %112 = vector.multi_reduction <add>, %111, %cst_37 [1] : vector<16x16xf32> to vector<16xf32>
    %113 = vector.shape_cast %112 : vector<16xf32> to vector<16x1xf32>
    %114 = tpu.reciprocal %113 : vector<16x1xf32> -> vector<16x1xf32>
    %115 = vector.broadcast %114 : vector<16x1xf32> to vector<16x16xf32>
    %116 = arith.mulf %111, %115 : vector<16x16xf32>
    %cst_38 = arith.constant dense<0.000000e+00> : vector<16x8xf32>
    %117 = tpu.matmul %116, %102, %cst_38 {dimension_numbers = #tpu.dot_dimension_numbers<[1], [0], [0], [1], [0, 0, 1, 1], [], []>} : vector<16x16xf32>, vector<16x8xf32>, vector<16x8xf32> -> vector<16x8xf32>
    %118 = vector.extract_strided_slice %56 {offsets = [16, 0], sizes = [8, 32], strides = [1, 1]} : vector<32x32xf32> to vector<8x32xf32>
    %cst_39 = arith.constant dense<0.000000e+00> : vector<16x32xf32>
    %119 = tpu.matmul %117, %118, %cst_39 {dimension_numbers = #tpu.dot_dimension_numbers<[1], [0], [0], [1], [0, 0, 1, 1], [], []>} : vector<16x8xf32>, vector<8x32xf32>, vector<16x32xf32> -> vector<16x32xf32>
    %120 = arith.addf %99, %119 : vector<16x32xf32>
    %121 = vector.extract_strided_slice %16 {offsets = [0, 24], sizes = [16, 8], strides = [1, 1]} : vector<16x64xf32> to vector<16x8xf32>
    %122 = vector.extract_strided_slice %16 {offsets = [0, 56], sizes = [16, 8], strides = [1, 1]} : vector<16x64xf32> to vector<16x8xf32>
    %123 = vector.extract_strided_slice %20 {offsets = [0, 24], sizes = [16, 8], strides = [1, 1]} : vector<16x32xf32> to vector<16x8xf32>
    %124 = tpu.transpose %122, [1, 0] : vector<16x8xf32> -> vector<8x16xf32>
    %cst_40 = arith.constant dense<0.000000e+00> : vector<16x16xf32>
    %125 = tpu.matmul %121, %124, %cst_40 {dimension_numbers = #tpu.dot_dimension_numbers<[1], [0], [0], [1], [0, 0, 1, 1], [], []>} : vector<16x8xf32>, vector<8x16xf32>, vector<16x16xf32> -> vector<16x16xf32>
    %cst_41 = arith.constant -1.000000e+30 : f32
    %126 = vector.broadcast %cst_41 : f32 to vector<16x16xf32>
    %127 = arith.select %55, %125, %126 : vector<16x16xi1>, vector<16x16xf32>
    %cst_42 = arith.constant dense<0xFF800000> : vector<16xf32>
    %128 = vector.multi_reduction <maximumf>, %127, %cst_42 [1] : vector<16x16xf32> to vector<16xf32>
    %129 = vector.shape_cast %128 : vector<16xf32> to vector<16x1xf32>
    %130 = vector.broadcast %129 : vector<16x1xf32> to vector<16x16xf32>
    %131 = arith.subf %127, %130 : vector<16x16xf32>
    %132 = math.exp %131 : vector<16x16xf32>
    %cst_43 = arith.constant dense<0.000000e+00> : vector<16xf32>
    %133 = vector.multi_reduction <add>, %132, %cst_43 [1] : vector<16x16xf32> to vector<16xf32>
    %134 = vector.shape_cast %133 : vector<16xf32> to vector<16x1xf32>
    %135 = tpu.reciprocal %134 : vector<16x1xf32> -> vector<16x1xf32>
    %136 = vector.broadcast %135 : vector<16x1xf32> to vector<16x16xf32>
    %137 = arith.mulf %132, %136 : vector<16x16xf32>
    %cst_44 = arith.constant dense<0.000000e+00> : vector<16x8xf32>
    %138 = tpu.matmul %137, %123, %cst_44 {dimension_numbers = #tpu.dot_dimension_numbers<[1], [0], [0], [1], [0, 0, 1, 1], [], []>} : vector<16x16xf32>, vector<16x8xf32>, vector<16x8xf32> -> vector<16x8xf32>
    %139 = vector.extract_strided_slice %56 {offsets = [24, 0], sizes = [8, 32], strides = [1, 1]} : vector<32x32xf32> to vector<8x32xf32>
    %cst_45 = arith.constant dense<0.000000e+00> : vector<16x32xf32>
    %140 = tpu.matmul %138, %139, %cst_45 {dimension_numbers = #tpu.dot_dimension_numbers<[1], [0], [0], [1], [0, 0, 1, 1], [], []>} : vector<16x8xf32>, vector<8x32xf32>, vector<16x32xf32> -> vector<16x32xf32>
    %141 = arith.addf %120, %140 : vector<16x32xf32>
    %142 = vector.broadcast %6 : vector<1x32xf32> to vector<16x32xf32>
    %143 = arith.addf %141, %142 : vector<16x32xf32>
    %144 = arith.addf %0, %143 : vector<16x32xf32>
    %cst_46 = arith.constant dense<0.000000e+00> : vector<16xf32>
    %145 = vector.multi_reduction <add>, %144, %cst_46 [1] : vector<16x32xf32> to vector<16xf32>
    %146 = vector.shape_cast %145 : vector<16xf32> to vector<16x1xf32>
    %cst_47 = arith.constant 3.200000e+01 : f32
    %147 = vector.broadcast %cst_47 : f32 to vector<16x1xf32>
    %148 = arith.divf %146, %147 : vector<16x1xf32>
    %149 = vector.broadcast %148 : vector<16x1xf32> to vector<16x32xf32>
    %150 = arith.subf %144, %149 : vector<16x32xf32>
    %151 = arith.mulf %150, %150 : vector<16x32xf32>
    %cst_48 = arith.constant dense<0.000000e+00> : vector<16xf32>
    %152 = vector.multi_reduction <add>, %151, %cst_48 [1] : vector<16x32xf32> to vector<16xf32>
    %153 = vector.shape_cast %152 : vector<16xf32> to vector<16x1xf32>
    %cst_49 = arith.constant 3.200000e+01 : f32
    %154 = vector.broadcast %cst_49 : f32 to vector<16x1xf32>
    %155 = arith.divf %153, %154 : vector<16x1xf32>
    %cst_50 = arith.constant 9.99999974E-6 : f32
    %156 = vector.broadcast %cst_50 : f32 to vector<16x1xf32>
    %157 = arith.addf %155, %156 : vector<16x1xf32>
    %158 = math.rsqrt %157 : vector<16x1xf32>
    %159 = vector.broadcast %158 : vector<16x1xf32> to vector<16x32xf32>
    %160 = arith.mulf %150, %159 : vector<16x32xf32>
    %161 = vector.broadcast %9 : vector<1x32xf32> to vector<16x32xf32>
    %162 = arith.mulf %160, %161 : vector<16x32xf32>
    %163 = vector.broadcast %10 : vector<1x32xf32> to vector<16x32xf32>
    %164 = arith.addf %162, %163 : vector<16x32xf32>
    %c0_51 = arith.constant 0 : index
    %c0_52 = arith.constant 0 : index
    %165 = vector.load %arg5[%c0_51, %c0_52] : memref<32x64xf32, #tpu.memory_space<vmem>>, vector<32x64xf32>
    %cst_53 = arith.constant dense<0.000000e+00> : vector<16x64xf32>
    %166 = tpu.matmul %164, %165, %cst_53 {dimension_numbers = #tpu.dot_dimension_numbers<[1], [0], [0], [1], [0, 0, 1, 1], [], []>} : vector<16x32xf32>, vector<32x64xf32>, vector<16x64xf32> -> vector<16x64xf32>
    %167 = vector.broadcast %7 : vector<1x64xf32> to vector<16x64xf32>
    %168 = arith.addf %166, %167 : vector<16x64xf32>
    %cst_54 = arith.constant 0.000000e+00 : f32
    %169 = vector.broadcast %cst_54 : f32 to vector<16x64xf32>
    %170 = arith.maximumf %168, %169 : vector<16x64xf32>
    %c0_55 = arith.constant 0 : index
    %c0_56 = arith.constant 0 : index
    %171 = vector.load %arg6[%c0_55, %c0_56] : memref<64x32xf32, #tpu.memory_space<vmem>>, vector<64x32xf32>
    %cst_57 = arith.constant dense<0.000000e+00> : vector<16x32xf32>
    %172 = tpu.matmul %170, %171, %cst_57 {dimension_numbers = #tpu.dot_dimension_numbers<[1], [0], [0], [1], [0, 0, 1, 1], [], []>} : vector<16x64xf32>, vector<64x32xf32>, vector<16x32xf32> -> vector<16x32xf32>
    %173 = vector.broadcast %8 : vector<1x32xf32> to vector<16x32xf32>
    %174 = arith.addf %172, %173 : vector<16x32xf32>
    %175 = arith.addf %164, %174 : vector<16x32xf32>
    %cst_58 = arith.constant dense<0.000000e+00> : vector<16xf32>
    %176 = vector.multi_reduction <add>, %175, %cst_58 [1] : vector<16x32xf32> to vector<16xf32>
    %177 = vector.shape_cast %176 : vector<16xf32> to vector<16x1xf32>
    %cst_59 = arith.constant 3.200000e+01 : f32
    %178 = vector.broadcast %cst_59 : f32 to vector<16x1xf32>
    %179 = arith.divf %177, %178 : vector<16x1xf32>
    %180 = vector.broadcast %179 : vector<16x1xf32> to vector<16x32xf32>
    %181 = arith.subf %175, %180 : vector<16x32xf32>
    %182 = arith.mulf %181, %181 : vector<16x32xf32>
    %cst_60 = arith.constant dense<0.000000e+00> : vector<16xf32>
    %183 = vector.multi_reduction <add>, %182, %cst_60 [1] : vector<16x32xf32> to vector<16xf32>
    %184 = vector.shape_cast %183 : vector<16xf32> to vector<16x1xf32>
    %cst_61 = arith.constant 3.200000e+01 : f32
    %185 = vector.broadcast %cst_61 : f32 to vector<16x1xf32>
    %186 = arith.divf %184, %185 : vector<16x1xf32>
    %cst_62 = arith.constant 9.99999974E-6 : f32
    %187 = vector.broadcast %cst_62 : f32 to vector<16x1xf32>
    %188 = arith.addf %186, %187 : vector<16x1xf32>
    %189 = math.rsqrt %188 : vector<16x1xf32>
    %190 = vector.broadcast %189 : vector<16x1xf32> to vector<16x32xf32>
    %191 = arith.mulf %181, %190 : vector<16x32xf32>
    %192 = vector.broadcast %11 : vector<1x32xf32> to vector<16x32xf32>
    %193 = arith.mulf %191, %192 : vector<16x32xf32>
    %194 = vector.broadcast %12 : vector<1x32xf32> to vector<16x32xf32>
    %195 = arith.addf %193, %194 : vector<16x32xf32>
    %196 = vector.extract_strided_slice %195 {offsets = [0, 0], sizes = [4, 32], strides = [1, 1]} : vector<16x32xf32> to vector<4x32xf32>
    %197 = vector.extract_strided_slice %195 {offsets = [4, 0], sizes = [4, 32], strides = [1, 1]} : vector<16x32xf32> to vector<4x32xf32>
    %198 = vector.extract_strided_slice %195 {offsets = [8, 0], sizes = [4, 32], strides = [1, 1]} : vector<16x32xf32> to vector<4x32xf32>
    %199 = vector.extract_strided_slice %195 {offsets = [12, 0], sizes = [4, 32], strides = [1, 1]} : vector<16x32xf32> to vector<4x32xf32>
    %200 = tpu.concatenate %196, %197, %198, %199 in 1 : vector<4x32xf32>, vector<4x32xf32>, vector<4x32xf32>, vector<4x32xf32> -> vector<4x128xf32>
    %c0_63 = arith.constant 0 : index
    %c0_64 = arith.constant 0 : index
    %201 = vector.load %arg8[%c0_63, %c0_64] : memref<4x128xf32, #tpu.memory_space<vmem>>, vector<4x128xf32>
    tpu.vector_store %arg8[%c0_63, %c0_64], %200 {strides = array<i32>} : memref<4x128xf32, #tpu.memory_space<vmem>>, vector<4x128xf32>,
    return
  }
}

</mosaic_0001>

<bundles_post_ra>
// kernel: transformer_encoder_layer.1
= control target key start
LH: loop header
LB: loop body
LE: loop exit
PB: predicated region body
PF: predicated region fallthrough
CT: control target
= control target key end

     0   :  { %13 = vsyncpa [#allocation3], 0  ;;  %s2583_s0 = inlined_call_operand.hbm [shape: f32[16,32], index: 0, kind: input, shape index: {}]   ;;  %s2584_s1 = inlined_call_operand.hbm [shape: f32[16,32], index: 1, kind: input, shape index: {}]   ;;  %s2585_s2 = inlined_call_operand.vmem [shape: f32[32,64], index: 2, kind: input, shape index: {}]   ;;  %s2586_s3 = inlined_call_operand.vmem [shape: f32[32,32], index: 3, kind: input, shape index: {}]   ;;  %s2587_s4 = inlined_call_operand.vmem [shape: f32[32,32], index: 4, kind: input, shape index: {}]   ;;  %s2588_s5 = inlined_call_operand.hbm [shape: f32[32,64], index: 5, kind: input, shape index: {}]   ;;  %s2589_s6 = inlined_call_operand.vmem [shape: f32[64,32], index: 6, kind: input, shape index: {}]   ;;  %s2590_s7 = inlined_call_operand.vmem [shape: f32[8,128], index: 7, kind: input, shape index: {}]   ;;  %s2591_s8 = inlined_call_operand.vmem [shape: f32[4,128], index: 8, kind: output, shape index: {}]  }
   0x1   :  { %14 = vsyncpa [#allocation5], 0  ;;  %s2216_s27 = smov [#allocation4]   ;;  %s2217_s29 = smov [#allocation2]  }
   0x2   :  { %s32_s28 = sshll.u32 %s2216_s27, 4  ;;  %s20_s30 = sshll.u32 %s2217_s29, 4  ;;  %s33_s28 = int_to_ptr.vmem [resolvable:$true] %s32_s28  ;;  %s2275_s30 = int_to_ptr.vmem [resolvable:$true] %s20_s30 }
   0x3   :  { %s2146_s11 = scalar_lea.hbm %s2584_s1, 256 }
   0x4   :  { %p2147_p0 = scmp.ne.s32.totalorder %s2584_s1, %s2146_s11  ;;  %p2150_p1 = scmp.lt.u32.totalorder %s2146_s11, %s2584_s1 }
   0x6   :  { %p2152_p2 = pnand %p2150_p1, %p2147_p0 }
   0x8   :  { %2155 = shalt.err (!%p2152_p2)
}
   0x9   :  { %s2156_s16 = scalar_lea.vmem %s33_s28, 256  ;;  %p2161_p4 = scmp.lt.s32.totalorder %s33_s28, %s33_s28 }
   0xa   :  { %p2157_p3 = scmp.ne.s32.totalorder %s33_s28, %s2156_s16  ;;  %p2162_p5 = scmp.lt.s32.totalorder %s2156_s16, %s2156_s16 }
   0xc   :  { %p2163_p6 = por %p2162_p5, %p2161_p4 }
   0xe   :  { %p2164_p7 = pnand %p2163_p6, %p2157_p3 }
  0x10   :  { %2167 = shalt.err (!%p2164_p7)
}
  0x11   :  { %s2218_s17 = smov 128   ;;  %s2219_s18 = smov 8  }
  0x12   :  { %38 = dma.hbm_to_vmem [thread:$0]  %s2584_s1, 256, %s33_s28, [#allocation5], %s2218_s17, %s2218_s17, %s2219_s18  }
  0x13   :  { %s2168_s23 = scalar_lea.hbm %s2583_s0, 256 }
  0x14   :  { %p2169_p8 = scmp.ne.s32.totalorder %s2583_s0, %s2168_s23  ;;  %p2172_p9 = scmp.lt.u32.totalorder %s2168_s23, %s2583_s0 }
  0x16   :  { %p2174_p10 = pnand %p2172_p9, %p2169_p8 }
  0x18   :  { %2177 = shalt.err (!%p2174_p10)
}
  0x19   :  { %s2178_s29 = scalar_lea.vmem %s2275_s30, 256  ;;  %p2183_p12 = scmp.lt.s32.totalorder %s2275_s30, %s2275_s30 }
  0x1a   :  { %p2179_p11 = scmp.ne.s32.totalorder %s2275_s30, %s2178_s29  ;;  %p2184_p13 = scmp.lt.s32.totalorder %s2178_s29, %s2178_s29 }
  0x1c   :  { %p2185_p0 = por %p2184_p13, %p2183_p12 }
  0x1e   :  { %p2186_p1 = pnand %p2185_p0, %p2179_p11 }
  0x20   :  { %2189 = shalt.err (!%p2186_p1)
}
  0x21   :  { %26 = dma.hbm_to_vmem [thread:$0]  %s2583_s0, 256, %s2275_s30, [#allocation3], %s2218_s17, %s2218_s17, %s2219_s18  }
  0x22   :  { %s2220_s9 = smov [#allocation6]   ;;  %s2190_s13 = scalar_lea.hbm %s2588_s5, 512 }
  0x23   :  { %s50_s10 = sshll.u32 %s2220_s9, 4  ;;  %p2191_p2 = scmp.ne.s32.totalorder %s2588_s5, %s2190_s13  ;;  %s51_s10 = int_to_ptr.vmem [resolvable:$true] %s50_s10 }
  0x24   :  { %p2194_p3 = scmp.lt.u32.totalorder %s2190_s13, %s2588_s5 }
  0x26   :  { %p2196_p4 = pnand %p2194_p3, %p2191_p2 }
  0x28   :  { %2199 = shalt.err (!%p2196_p4)
}
  0x29   :  { %s2200_s20 = scalar_lea.vmem %s51_s10, 512  ;;  %p2205_p6 = scmp.lt.s32.totalorder %s51_s10, %s51_s10 }
  0x2a   :  { %p2201_p5 = scmp.ne.s32.totalorder %s51_s10, %s2200_s20  ;;  %p2206_p7 = scmp.lt.s32.totalorder %s2200_s20, %s2200_s20 }
  0x2c   :  { %p2207_p8 = por %p2206_p7, %p2205_p6 }
  0x2e   :  { %p2208_p9 = pnand %p2207_p8, %p2201_p5 }
  0x30   :  { %2211 = shalt.err (!%p2208_p9)
}
  0x31   :  { %56 = dma.hbm_to_vmem [thread:$0]  %s2588_s5, 512, %s51_s10, [#allocation5], %s2218_s17, %s2218_s17, %s2219_s18  }
  0x32   :  { %2212 = dma.done.wait [#allocation3], 256  }
  0x33   :  { %2213 = vsyncadd [#allocation3], 4294967040 }
  0x34   :  { %2214 = dma.done.wait [#allocation5], 768  }
  0x35   :  { %2215 = vsyncadd [#allocation5], 4294966528  ;;  %v77_v0 = vld [vmem:[%s2585_s2] sm:$0xff]  ;;  %v78_v1 = vld [vmem:[%s2585_s2 + $0x8] sm:$0xff]  ;;  %vm85_vm0 = vcmask 261120   ;;  %v81_v12 = vlaneseq  ;;  %vm309_vm1 = vcmask 64512  }
  0x36   :  { %v79_v2 = vld [vmem:[%s2585_s2 + $0x10] sm:$0xff]  ;;  %v1971_v3 = vpack.c.bf16 %v78_v1, %v77_v0  ;;  %v80_v4 = vld [vmem:[%s2585_s2 + $0x18] sm:$0xff]  ;;  %v2339_v5 = vld [vmem:[#allocation2] sm:$0xff]  ;;  %s2221_s10 = smov 96   ;;  %vm395_vm5 = vcmask 130048   ;;  %s2223_s13 = smov 120  }
  0x37   :  { %v72_v6 = vld [vmem:[#allocation4] sm:$0xff]  ;;  %v1975_v7 = vpack.c.bf16 %v80_v4, %v79_v2  ;;  %v2343_v9 = vld [vmem:[#allocation2 + $0x8] sm:$0xff]  ;;  %v73_v10 = vld [vmem:[#allocation4 + $0x8] sm:$0xff]  ;;  %v2349_v13 = vshrl.u32 %v81_v12, 7  ;;  %v260_v34 = vand.u32 127, %v81_v12  ;;  %s2224_s14 = smov 80  }
  0x38   :  { %v74_v8 = vadd.f32 %v72_v6, %v2339_v5  ;;  %1972 = vmatprep.subr.bf16.mxu1 %v1971_v3  ;;  %v75_v11 = vadd.f32 %v73_v10, %v2343_v9  ;;  %v2355_v15 = vld [vmem:[%s2590_s7] sm:$0xff]  ;;  %v168_v23 = vld [vmem:[%s2586_s3 + $0x8] sm:$0xff]  ;;  %v169_v24 = vld [vmem:[%s2586_s3 + $0x10] sm:$0xff]  ;;  %s2225_s15 = smov 112   ;;  %s2226_s16 = smov 104   ;;  %vm1585_vm6 = vcmask 523264  }
  0x39   :  { %1974 = vmatpush3.bf16.msra.mxu1 %v1971_v3  ;;  %v83_v14 = vsub.s32 0, %v2349_v13  ;;  %v167_v22 = vld [vmem:[%s2586_s3] sm:$0xff]  ;;  %v170_v26 = vld [vmem:[%s2586_s3 + $0x18] sm:$0xff]  ;;  %vm2386_vm2 = vmpackc.low %vm309_vm1, %vm309_vm1  ;;  %v258_v33 = vadd.s32 8, %v2349_v13  ;;  %v289_v36 = vand.u32 1, %v260_v34  ;;  %v265_v37 = vand.u32 1, %v2349_v13 }
  0x3a   :  { %1851 = vmatprep.mubr.msk.f32.mxu1 %vm85_vm0, %v74_v8  ;;  %1976 = vmatprep.subr.bf16.mxu1 %v1975_v7  ;;  %v1979_v25 = vpack.c.bf16 %v168_v23, %v167_v22  ;;  %v1983_v27 = vpack.c.bf16 %v170_v26, %v169_v24  ;;  %v173_v46 = vsub.s32 1, %v2349_v13  ;;  %s2222_s3 = smov 88   ;;  %s2227_s19 = smov 72   ;;  %v300_v31 = vld [vmem:[%s2587_s4 + $0x8] sm:$0xff]  ;;  %v301_v38 = vld [vmem:[%s2587_s4 + $0x10] sm:$0xff]  ;;  %vm1722_vm7 = vcmask 785408  }
  0x3b   :  { %v84_v16 = vrot.slane %v2355_v15, %v83_v14  ;;  %v272_v35 = vand.u32 1, %v258_v33  ;;  %vm2402_vm4 = vcmp.eq.s32.totalorder %v265_v37, %v289_v36 }
  0x3c   :  { %v174_v47 = vrot.slane %v2355_v15, %v173_v46 }
  0x3d   :  { %1978 = vmatpush3.bf16.msra.mxu1 %v1975_v7  ;;  %vm2398_vm3 = vcmp.eq.s32.totalorder %v272_v35, %v289_v36 }
  0x3e   :  { %1980 = vmatprep.subr.bf16.mxu1 %v1979_v25 }
  0x40   :  { %1852 = vmatmul.mubr.msk.f32.vlgmr.msra.gmra.mrb[0].mxu1 %vm85_vm0, %v75_v11 }
  0x41   :  { %1862 = vmatprep.mubr.msk.f32.mxu1 %vm85_vm0, %v2339_v5  ;;  %1982 = vmatpush3.bf16.msra.mxu1 %v1979_v25 }
  0x42   :  { %1984 = vmatprep.subr.bf16.mxu1 %v1983_v27 }
  0x45   :  { %1986 = vmatpush3.bf16.msra.mxu1 %v1983_v27 }
  0x48   :  { %1863 = vmatmul.mubr.msk.f32.vlgmr.msra.gmra.mrb[2].mxu1 %vm85_vm0, %v2343_v9 }
 0x113   :  { %v1853_v17 = vpop.f32.mrb[0].mxu1 }
 0x114   :  { %v2358_v18 = vadd.f32 %v1853_v17, %v84_v16  ;;  %v158_v19 = vpop.f32.mrb[1].mxu1 }
 0x115   :  { %v2360_v20 = vadd.f32 %v158_v19, %v84_v16 }
 0x117   :  { %1869 = vmatprep.mubr.msk.f32.mxu0 %vm309_vm1, %v2360_v20  ;;  %v2366_v21 = vpack.i.bf16 %v2358_v18, %v2360_v20 }
 0x119   :  { %2072 = vrot.lane.b32.xlu0 %v2366_v21, %s2221_s10 }
 0x11b   :  { %v1864_v48 = vpop.f32.mrb[2].mxu1 }
 0x11c   :  { %v247_v49 = vpop.f32.mrb[3].mxu1  ;;  %v2414_v50 = vadd.f32 %v1864_v48, %v174_v47 }
 0x11d   :  { %v2416_v51 = vadd.f32 %v247_v49, %v174_v47 }
 0x11f   :  { %v1993_v52 = vpack.c.bf16 %v2414_v50, %v2416_v51  ;;  %v2458_v35 = vpack.i.bf16 %v2414_v50, %v2416_v51 }
 0x121   :  { %1994 = vmatprep.subr.bf16.mxu1 %v1993_v52 }
 0x122   :  { %1996 = vmatpush3.bf16.msra.mxu1 %v1993_v52 }
 0x18b   :  { %v2073_v28 = vpop.permute.xlu0 %2072 }
 0x18c   :  { %v2075_v29 = vunpack.i.h.bf16 %v2073_v28  ;;  %v2074_v30 = vunpack.i.l.bf16 %v2073_v28 }
 0x18e   :  { %v1987_v32 = vpack.c.bf16 %v2075_v29, %v2074_v30 }
 0x190   :  { %1989 = vmatprep.subr.msk.bf16.mxu0 %vm2386_vm2, %v1987_v32 }
 0x191   :  { %1992 = vmatpush3.bf16.xpose.msk.msra.mxu0 %vm2386_vm2, %v1987_v32 }
 0x198   :  { %1870 = vmatmul.mubr.msk.f32.vlgmr.msra.gmra.mrb[0].mxu0 %vm309_vm1, %v2358_v18 }
 0x26b   :  { %v1871_v40 = vpop.f32.mrb[0].mxu0 }
 0x26c   :  { %v394_v41 = vsel %vm2398_vm3, %v1871_v40, -1e+30  ;;  %v384_v42 = vpop.f32.mrb[1].mxu0 }
 0x26d   :  { %v393_v43 = vsel %vm2402_vm4, %v384_v42, -1e+30  ;;  %v399_v44 = vsel %vm395_vm5, %v394_v41, -inf }
 0x26e   :  { %400 = vmax.xlane.f32.xlu1 %v399_v44  ;;  %v396_v45 = vsel %vm395_vm5, %v393_v43, -inf }
 0x26f   :  { %397 = vmax.xlane.f32.xlu0 %v396_v45 }
 0x27f   :  { %2077 = vrot.lane.b32.xlu1 %v2366_v21, %s2222_s3 }
 0x283   :  { %499 = vrot.lane.b32.xlu1 %v2360_v20, %s2223_s13 }
 0x285   :  { %2082 = vrot.lane.b32.xlu0 %v2366_v21, %s2224_s14  ;;  %s2229_s14 = smov 64  }
 0x2fb   :  { %v401_v53 = vpop.xlane.xlu1 %400 }
 0x2fc   :  { %v403_v54 = vsub.f32 %v394_v41, %v401_v53  ;;  %v398_v55 = vpop.xlane.xlu0 %397 }
 0x2fd   :  { %v402_v56 = vsub.f32 %v393_v43, %v398_v55 }
 0x2fe   :  { %v406_v57 = vmul.f32 1.442695, %v403_v54 }
 0x2ff   :  { %v404_v58 = vmul.f32 1.442695, %v402_v56  ;;  %v2078_v59 = vpop.permute.xlu1 %2077 }
 0x300   :  { %2106 = vpow2.f32 %v406_v57  ;;  %v2080_v60 = vunpack.i.h.bf16 %v2078_v59  ;;  %v2079_v61 = vunpack.i.l.bf16 %v2078_v59  ;;  %v2083_v7 = vpop.permute.xlu0 %2082 }
 0x301   :  { %2108 = vpow2.f32 %v404_v58  ;;  %v2085_v11 = vunpack.i.h.bf16 %v2083_v7  ;;  %v2084_v12 = vunpack.i.l.bf16 %v2083_v7 }
 0x302   :  { %v1997_v62 = vpack.c.bf16 %v2080_v60, %v2079_v61 }
 0x303   :  { %v500_v3 = vpop.permute.xlu1 %499  ;;  %v2007_v17 = vpack.c.bf16 %v2085_v11, %v2084_v12 }
 0x304   :  { %1999 = vmatprep.subr.msk.bf16.mxu1 %vm2386_vm2, %v1997_v62 }
 0x30a   :  { %v2107_v63 = vpop.eup %2106 }
 0x30b   :  { %v411_v0 = vsel %vm395_vm5, %v2107_v63, 0.0  ;;  %v2109_v1 = vpop.eup %2108 }
 0x30c   :  { %412 = vadd.xlane.f32.xlu1 %v411_v0  ;;  %v408_v2 = vsel %vm395_vm5, %v2109_v1, 0.0 }
 0x310   :  { %409 = vadd.xlane.f32.xlu1 %v408_v2 }
 0x321   :  { %501 = vrot.lane.b32.xlu1 %v2358_v18, %s2223_s13 }
 0x325   :  { %865 = vrot.lane.b32.xlu1 %v2360_v20, %s2225_s15 }
 0x329   :  { %867 = vrot.lane.b32.xlu1 %v2358_v18, %s2225_s15 }
 0x399   :  { %v413_v4 = vpop.xlane.xlu1 %412 }
 0x39a   :  { %2110 = vrcp.f32 %v413_v4 }
 0x39d   :  { %v410_v6 = vpop.xlane.xlu1 %409 }
 0x39e   :  { %2112 = vrcp.f32 %v410_v6 }
 0x3a1   :  { %v502_v19 = vpop.permute.xlu1 %501 }
 0x3a4   :  { %v2111_v8 = vpop.eup %2110 }
 0x3a5   :  { %v417_v16 = vmul.f32 %v2111_v8, %v2107_v63  ;;  %v866_v22 = vpop.permute.xlu1 %865 }
 0x3a8   :  { %v2113_v10 = vpop.eup %2112 }
 0x3a9   :  { %v416_v14 = vmul.f32 %v2113_v10, %v2109_v1  ;;  %v868_v23 = vpop.permute.xlu1 %867 }
 0x3ab   :  { %1876 = vmatprep.mubr.msk.f32.mxu1 %vm395_vm5, %v416_v14  ;;  %v299_v14 = vld [vmem:[%s2587_s4] sm:$0xff] }
 0x3ac   :  { %1877 = vmatmul.mubr.msk.f32.vlgmr.msra.gmra.mrb[4].mxu1 %vm395_vm5, %v417_v16 }
 0x3ad   :  { %2002 = vmatpush3.bf16.xpose.msk.msra.mxu1 %vm2386_vm2, %v1997_v62  ;;  %1883 = vmatprep.mubr.msk.f32.mxu1 %vm309_vm1, %v500_v3 }
 0x3ae   :  { %2009 = vmatprep.subr.msk.bf16.mxu1 %vm2386_vm2, %v2007_v17 }
 0x3b4   :  { %1884 = vmatmul.mubr.msk.f32.vlgmr.msra.gmra.mrb[6].mxu1 %vm309_vm1, %v502_v19 }
 0x3b5   :  { %2012 = vmatpush3.bf16.xpose.msk.msra.mxu1 %vm2386_vm2, %v2007_v17  ;;  %1907 = vmatprep.mubr.msk.f32.mxu1 %vm309_vm1, %v866_v22 }
 0x3bc   :  { %1908 = vmatmul.mubr.msk.f32.vlgmr.msra.gmra.mrb[8].mxu1 %vm309_vm1, %v868_v23 }
 0x47f   :  { %v2446_v24 = vpop.f32.mrb[4].mxu1 }
 0x480   :  { %v2448_v25 = vpop.f32.mrb[5].mxu1 }
 0x487   :  { %v1885_v26 = vpop.f32.mrb[6].mxu1 }
 0x488   :  { %v591_v27 = vsel %vm2398_vm3, %v1885_v26, -1e+30  ;;  %v581_v28 = vpop.f32.mrb[7].mxu1 }
 0x489   :  { %v590_v29 = vsel %vm2402_vm4, %v581_v28, -1e+30  ;;  %v595_v30 = vsel %vm395_vm5, %v591_v27, -inf }
 0x48a   :  { %596 = vmax.xlane.f32.xlu0 %v595_v30  ;;  %v592_v32 = vsel %vm395_vm5, %v590_v29, -inf }
 0x48b   :  { %593 = vmax.xlane.f32.xlu1 %v592_v32 }
 0x48f   :  { %v1909_v33 = vpop.f32.mrb[8].mxu1 }
 0x490   :  { %v947_v34 = vpop.f32.mrb[9].mxu1  ;;  %v957_v36 = vsel %vm2398_vm3, %v1909_v33, -1e+30 }
 0x491   :  { %v961_v37 = vsel %vm395_vm5, %v957_v36, -inf  ;;  %v956_v57 = vsel %vm2402_vm4, %v947_v34, -1e+30 }
 0x492   :  { %v958_v58 = vsel %vm395_vm5, %v956_v57, -inf }
 0x4a0   :  { %2087 = vrot.lane.b32.xlu0 %v2458_v35, %s2223_s13 }
 0x4a4   :  { %1152 = vrot.lane.b32.xlu0 %v2358_v18, %s2226_s16 }
 0x4c3   :  { %962 = vmax.xlane.f32.xlu0 %v961_v37 }
 0x517   :  { %v597_v40 = vpop.xlane.xlu0 %596 }
 0x518   :  { %v599_v41 = vsub.f32 %v591_v27, %v597_v40  ;;  %v594_v42 = vpop.xlane.xlu1 %593 }
 0x519   :  { %v598_v43 = vsub.f32 %v590_v29, %v594_v42 }
 0x51a   :  { %v602_v44 = vmul.f32 1.442695, %v599_v41 }
 0x51b   :  { %v600_v45 = vmul.f32 1.442695, %v598_v43  ;;  %v2088_v46 = vpop.permute.xlu0 %2087 }
 0x51c   :  { %v2090_v47 = vunpack.i.h.bf16 %v2088_v46  ;;  %v2089_v48 = vunpack.i.l.bf16 %v2088_v46 }
 0x51d   :  { %2114 = vpow2.f32 %v600_v45 }
 0x51e   :  { %v2003_v49 = vpack.c.bf16 %v2090_v47, %v2089_v48  ;;  %2116 = vpow2.f32 %v602_v44 }
 0x51f   :  { %v1153_v53 = vpop.permute.xlu0 %1152 }
 0x520   :  { %2004 = vmatprep.subr.bf16.mxu0 %v2003_v49 }
 0x521   :  { %2006 = vmatpush3.bf16.msra.mxu0 %v2003_v49 }
 0x522   :  { %1893 = vmatprep.subr.mxu0 %v300_v31 }
 0x527   :  { %v2115_v18 = vpop.eup %2114 }
 0x528   :  { %v604_v50 = vsel %vm395_vm5, %v2115_v18, 0.0  ;;  %v2117_v51 = vpop.eup %2116 }
 0x529   :  { %605 = vadd.xlane.f32.xlu1 %v604_v50  ;;  %v607_v52 = vsel %vm395_vm5, %v2117_v51, 0.0 }
 0x52d   :  { %608 = vadd.xlane.f32.xlu1 %v607_v52 }
 0x53e   :  { %2092 = vrot.lane.b32.xlu1 %v2366_v21, %s2227_s19 }
 0x542   :  { %1150 = vrot.lane.b32.xlu1 %v2360_v20, %s2226_s16 }
 0x550   :  { %v963_v54 = vpop.xlane.xlu0 %962 }
 0x551   :  { %v965_v55 = vsub.f32 %v957_v36, %v963_v54 }
 0x553   :  { %v968_v56 = vmul.f32 1.442695, %v965_v55 }
 0x555   :  { %2118 = vpow2.f32 %v968_v56 }
 0x55f   :  { %v2475_v59 = vpop.eup %2118 }
 0x560   :  { %v973_v60 = vsel %vm395_vm5, %v2475_v59, 0.0 }
 0x566   :  { %959 = vmax.xlane.f32.xlu1 %v958_v58 }
 0x56a   :  { %974 = vadd.xlane.f32.xlu1 %v973_v60 }
 0x5b6   :  { %v606_v21 = vpop.xlane.xlu1 %605 }
 0x5b7   :  { %2120 = vrcp.f32 %v606_v21 }
 0x5ba   :  { %v609_v20 = vpop.xlane.xlu1 %608 }
 0x5bb   :  { %2122 = vrcp.f32 %v609_v20 }
 0x5be   :  { %v2093_v61 = vpop.permute.xlu1 %2092 }
 0x5bf   :  { %v2095_v62 = vunpack.i.h.bf16 %v2093_v61  ;;  %v2094_v63 = vunpack.i.l.bf16 %v2093_v61  ;;  %v1437_v61 = vsub.s32 2, %v2349_v13 }
 0x5c1   :  { %v2121_v0 = vpop.eup %2120  ;;  %v2017_v1 = vpack.c.bf16 %v2095_v62, %v2094_v63  ;;  %v1438_v62 = vrot.slane %v2355_v15, %v1437_v61 }
 0x5c2   :  { %v1151_v2 = vpop.permute.xlu1 %1150  ;;  %v612_v3 = vmul.f32 %v2121_v0, %v2115_v18 }
 0x5c3   :  { %2019 = vmatprep.subr.msk.bf16.mxu1 %vm2386_vm2, %v2017_v1  ;;  %1926 = vmatprep.mubr.msk.f32.mxu1 %vm309_vm1, %v1151_v2 }
 0x5c4   :  { %1890 = vmatprep.mubr.msk.f32.mxu0 %vm395_vm5, %v612_v3  ;;  %2022 = vmatpush3.bf16.xpose.msk.msra.mxu1 %vm2386_vm2, %v2017_v1 }
 0x5c5   :  { %v2123_v4 = vpop.eup %2122 }
 0x5c6   :  { %v613_v6 = vmul.f32 %v2123_v4, %v2117_v51 }
 0x5c8   :  { %1891 = vmatmul.mubr.msk.f32.vlgmr.msra.gmra.mrb[2].mxu0 %vm395_vm5, %v613_v6 }
 0x5c9   :  { %1894 = vmatpush3.msra.mxu0 %v300_v31 }
 0x5ca   :  { %1898 = vmatprep.subr.mxu0 %v299_v14 }
 0x5cb   :  { %1927 = vmatmul.mubr.msk.f32.vlgmr.msra.gmra.mrb[10].mxu1 %vm309_vm1, %v1153_v53 }
 0x5f3   :  { %v960_v7 = vpop.xlane.xlu1 %959 }
 0x5f4   :  { %v964_v8 = vsub.f32 %v956_v57, %v960_v7  ;;  %v302_v57 = vld [vmem:[%s2587_s4 + $0x18] sm:$0xff] }
 0x5f6   :  { %v966_v10 = vmul.f32 1.442695, %v964_v8 }
 0x5f7   :  { %v975_v19 = vpop.xlane.xlu1 %974 }
 0x5f8   :  { %2124 = vpow2.f32 %v966_v10 }
 0x602   :  { %v2125_v11 = vpop.eup %2124 }
 0x603   :  { %v970_v12 = vsel %vm395_vm5, %v2125_v11, 0.0 }
 0x604   :  { %971 = vadd.xlane.f32.xlu0 %v970_v12 }
 0x61a   :  { %2097 = vrot.lane.b32.xlu0 %v2458_v35, %s2225_s15 }
 0x691   :  { %v972_v16 = vpop.xlane.xlu0 %971 }
 0x692   :  { %2126 = vrcp.f32 %v972_v16 }
 0x693   :  { %2128 = vrcp.f32 %v975_v19 }
 0x695   :  { %v2098_v17 = vpop.permute.xlu0 %2097 }
 0x696   :  { %v2100_v22 = vunpack.i.h.bf16 %v2098_v17  ;;  %v2099_v23 = vunpack.i.l.bf16 %v2098_v17 }
 0x698   :  { %v2013_v28 = vpack.c.bf16 %v2100_v22, %v2099_v23  ;;  %v1482_v23 = vld [vmem:[#allocation6] sm:$0xff] }
 0x69b   :  { %v1892_v26 = vpop.f32.mrb[2].mxu0 }
 0x69c   :  { %v694_v27 = vpop.f32.mrb[3].mxu0  ;;  %v2127_v34 = vpop.eup %2126 }
 0x69d   :  { %1895 = vmatprep.mubr.msk.f32.mxu0 %vm309_vm1, %v694_v27  ;;  %v2129_v37 = vpop.eup %2128  ;;  %v978_v41 = vmul.f32 %v2127_v34, %v2125_v11  ;;  %v1575_v34 = vld [vmem:[%s2589_s6 + $0x10] sm:$0xff] }
 0x69e   :  { %1896 = vmatmul.mubr.msk.f32.vlgmr.msra.gmra.mrb[4].mxu0 %vm309_vm1, %v1892_v26  ;;  %v1928_v29 = vpop.f32.mrb[10].mxu1  ;;  %v979_v39 = vmul.f32 %v2129_v37, %v2475_v59  ;;  %v1483_v26 = vld [vmem:[#allocation6 + $0x8] sm:$0xff]  ;;  %v1576_v37 = vld [vmem:[%s2589_s6 + $0x18] sm:$0xff] }
 0x69f   :  { %1899 = vmatpush3.msra.mxu0 %v299_v14  ;;  %1900 = vmatprep.mubr.msk.f32.mxu0 %vm309_vm1, %v2448_v25  ;;  %v1232_v30 = vpop.f32.mrb[11].mxu1  ;;  %v1242_v36 = vsel %vm2398_vm3, %v1928_v29, -1e+30  ;;  %v2027_v27 = vpack.c.bf16 %v1483_v26, %v1482_v23  ;;  %v1485_v29 = vld [vmem:[#allocation6 + $0x18] sm:$0xff] }
 0x6a0   :  { %2014 = vmatprep.subr.bf16.mxu0 %v2013_v28  ;;  %v1241_v32 = vsel %vm2402_vm4, %v1232_v30, -1e+30  ;;  %v1246_v40 = vsel %vm395_vm5, %v1242_v36, -inf }
 0x6a1   :  { %v1243_v33 = vsel %vm395_vm5, %v1241_v32, -inf  ;;  %2028 = vmatprep.subr.bf16.mxu1 %v2027_v27 }
 0x6a2   :  { %1244 = vmax.xlane.f32.xlu1 %v1243_v33  ;;  %2030 = vmatpush3.bf16.msra.mxu1 %v2027_v27  ;;  %v1574_v33 = vld [vmem:[%s2589_s6 + $0x8] sm:$0xff] }
 0x6a6   :  { %1901 = vmatmul.mubr.msk.f32.vlgmr.msra.gmra.mrb[4].mxu0 %vm309_vm1, %v2446_v24  ;;  %1247 = vmax.xlane.f32.xlu1 %v1246_v40  ;;  %v2039_v40 = vpack.c.bf16 %v1576_v37, %v1575_v34 }
 0x6a7   :  { %2016 = vmatpush3.bf16.msra.mxu0 %v2013_v28  ;;  %1914 = vmatprep.mubr.msk.f32.mxu0 %vm395_vm5, %v978_v41  ;;  %v1484_v28 = vld [vmem:[#allocation6 + $0x10] sm:$0xff]  ;;  %v1577_v41 = vld [vmem:[%s2589_s6 + $0x20] sm:$0xff] }
 0x6a8   :  { %1917 = vmatprep.subr.mxu0 %v301_v38  ;;  %v2031_v30 = vpack.c.bf16 %v1485_v29, %v1484_v28 }
 0x6aa   :  { %1915 = vmatmul.mubr.msk.f32.vlgmr.msra.gmra.mrb[6].mxu0 %vm395_vm5, %v979_v39  ;;  %2032 = vmatprep.subr.bf16.mxu1 %v2031_v30  ;;  %v1578_v39 = vld [vmem:[%s2589_s6 + $0x28] sm:$0xff] }
 0x6ab   :  { %1918 = vmatpush3.msra.mxu0 %v301_v38  ;;  %2034 = vmatpush3.bf16.msra.mxu1 %v2031_v30  ;;  %v2043_v38 = vpack.c.bf16 %v1578_v39, %v1577_v41 }
 0x72f   :  { %v1245_v25 = vpop.xlane.xlu1 %1244 }
 0x730   :  { %v1249_v42 = vsub.f32 %v1241_v32, %v1245_v25  ;;  %v1573_v32 = vld [vmem:[%s2589_s6] sm:$0xff] }
 0x732   :  { %v1251_v45 = vmul.f32 1.442695, %v1249_v42 }
 0x733   :  { %v1248_v43 = vpop.xlane.xlu1 %1247 }
 0x734   :  { %v1250_v44 = vsub.f32 %v1242_v36, %v1248_v43  ;;  %v2035_v36 = vpack.c.bf16 %v1574_v33, %v1573_v32 }
 0x736   :  { %v1253_v24 = vmul.f32 1.442695, %v1250_v44 }
 0x738   :  { %2130 = vpow2.f32 %v1253_v24 }
 0x739   :  { %2132 = vpow2.f32 %v1251_v45 }
 0x742   :  { %v2131_v46 = vpop.eup %2130 }
 0x743   :  { %v1258_v47 = vsel %vm395_vm5, %v2131_v46, 0.0  ;;  %v2133_v48 = vpop.eup %2132 }
 0x744   :  { %1259 = vadd.xlane.f32.xlu1 %v1258_v47  ;;  %v1255_v49 = vsel %vm395_vm5, %v2133_v48, 0.0 }
 0x748   :  { %1256 = vadd.xlane.f32.xlu1 %v1255_v49 }
 0x759   :  { %2102 = vrot.lane.b32.xlu1 %v2458_v35, %s2226_s16 }
 0x77d   :  { %v1916_v18 = vpop.f32.mrb[6].mxu0 }
 0x77e   :  { %v1058_v50 = vpop.f32.mrb[7].mxu0 }
 0x77f   :  { %1919 = vmatprep.mubr.msk.f32.mxu0 %vm309_vm1, %v1058_v50 }
 0x780   :  { %1920 = vmatmul.mubr.msk.f32.vlgmr.msra.gmra.mrb[4].mxu0 %vm309_vm1, %v1916_v18 }
 0x7d1   :  { %v1260_v51 = vpop.xlane.xlu1 %1259 }
 0x7d2   :  { %2134 = vrcp.f32 %v1260_v51 }
 0x7d5   :  { %v1257_v52 = vpop.xlane.xlu1 %1256 }
 0x7d6   :  { %2136 = vrcp.f32 %v1257_v52 }
 0x7d9   :  { %v2103_v53 = vpop.permute.xlu1 %2102 }
 0x7da   :  { %v2105_v54 = vunpack.i.h.bf16 %v2103_v53  ;;  %v2104_v55 = vunpack.i.l.bf16 %v2103_v53 }
 0x7dc   :  { %v2023_v56 = vpack.c.bf16 %v2105_v54, %v2104_v55  ;;  %v2135_v35 = vpop.eup %2134  ;;  %v1579_v54 = vld [vmem:[%s2589_s6 + $0x30] sm:$0xff]  ;;  %v1580_v55 = vld [vmem:[%s2589_s6 + $0x38] sm:$0xff]  ;;  %s2228_s6 = smov 32  }
 0x7dd   :  { %v1264_v60 = vmul.f32 %v2135_v35, %v2131_v46 }
 0x7de   :  { %2024 = vmatprep.subr.bf16.mxu0 %v2023_v56 }
 0x7df   :  { %2026 = vmatpush3.bf16.msra.mxu0 %v2023_v56  ;;  %v2047_v56 = vpack.c.bf16 %v1580_v55, %v1579_v54 }
 0x7e0   :  { %v2137_v58 = vpop.eup %2136  ;;  %1936 = vmatprep.subr.mxu0 %v302_v57 }
 0x7e1   :  { %v1263_v59 = vmul.f32 %v2137_v58, %v2133_v48 }
 0x7e3   :  { %1933 = vmatprep.mubr.msk.f32.mxu0 %vm395_vm5, %v1263_v59 }
 0x7e4   :  { %1934 = vmatmul.mubr.msk.f32.vlgmr.msra.gmra.mrb[8].mxu0 %vm395_vm5, %v1264_v60 }
 0x7e5   :  { %1937 = vmatpush3.msra.mxu0 %v302_v57  ;;  %v1488_v57 = vsub.s32 3, %v2349_v13 }
 0x7e6   :  { %2036 = vmatprep.subr.bf16.mxu0 %v2035_v36 }
 0x7e7   :  { %v1489_v35 = vrot.slane %v2355_v15, %v1488_v57 }
 0x8b7   :  { %v1935_v21 = vpop.f32.mrb[8].mxu0 }
 0x8b8   :  { %v1343_v20 = vpop.f32.mrb[9].mxu0 }
 0x8b9   :  { %1938 = vmatprep.mubr.msk.f32.mxu0 %vm309_vm1, %v1343_v20 }
 0x8ba   :  { %1939 = vmatmul.mubr.msk.f32.vlgmr.msra.gmra.mrb[4].mxu0 %vm309_vm1, %v1935_v21 }
 0x8bb   :  { %2038 = vmatpush3.bf16.msra.mxu0 %v2035_v36 }
 0x8bc   :  { %2040 = vmatprep.subr.bf16.mxu0 %v2039_v40 }
 0x8bf   :  { %2042 = vmatpush3.bf16.msra.mxu0 %v2039_v40 }
 0x8c0   :  { %2044 = vmatprep.subr.bf16.mxu0 %v2043_v38 }
 0x8c3   :  { %2046 = vmatpush3.bf16.msra.mxu0 %v2043_v38 }
 0x8c4   :  { %2048 = vmatprep.subr.bf16.mxu0 %v2047_v56 }
 0x8c7   :  { %2050 = vmatpush3.bf16.msra.mxu0 %v2047_v56 }
 0x98d   :  { %v1940_v63 = vpop.f32.mrb[4].mxu0 }
 0x98e   :  { %v1440_v0 = vadd.f32 %v1940_v63, %v1438_v62  ;;  %v1424_v1 = vpop.f32.mrb[5].mxu0 }
 0x98f   :  { %v1439_v2 = vadd.f32 %v1438_v62, %v1424_v1  ;;  %v1583_v62 = vsub.s32 4, %v2349_v13 }
 0x990   :  { %v1442_v3 = vadd.f32 %v1440_v0, %v2343_v9 }
 0x991   :  { %v1441_v4 = vadd.f32 %v1439_v2, %v2339_v5  ;;  %v1472_v5 = vsub.s32 5, %v2349_v13  ;;  %v1584_v63 = vrot.slane %v2355_v15, %v1583_v62 }
 0x992   :  { %v1446_v6 = vsel %vm85_vm0, %v1442_v3, 0.0 }
 0x993   :  { %1447 = vadd.xlane.f32.xlu1 %v1446_v6  ;;  %v1443_v7 = vsel %vm85_vm0, %v1441_v4, 0.0  ;;  %v1473_v22 = vrot.slane %v2355_v15, %v1472_v5 }
 0x994   :  { %1444 = vadd.xlane.f32.xlu0 %v1443_v7 }
 0xa20   :  { %v1448_v8 = vpop.xlane.xlu1 %1447 }
 0xa21   :  { %v1451_v10 = vmul.f32 0.03125, %v1448_v8  ;;  %v1445_v11 = vpop.xlane.xlu0 %1444 }
 0xa22   :  { %v1450_v12 = vmul.f32 0.03125, %v1445_v11 }
 0xa23   :  { %v1453_v31 = vsub.f32 %v1442_v3, %v1451_v10  ;;  %v1697_v10 = vsub.s32 6, %v2349_v13 }
 0xa24   :  { %v1452_v14 = vsub.f32 %v1441_v4, %v1450_v12 }
 0xa25   :  { %v1455_v19 = vmul.f32 %v1453_v31, %v1453_v31  ;;  %v1698_v11 = vrot.slane %v2355_v15, %v1697_v10 }
 0xa26   :  { %v1454_v16 = vmul.f32 %v1452_v14, %v1452_v14 }
 0xa27   :  { %v1459_v9 = vsel %vm85_vm0, %v1455_v19, 0.0 }
 0xa28   :  { %v1456_v17 = vsel %vm85_vm0, %v1454_v16, 0.0 }
 0xa29   :  { %1457 = vadd.xlane.f32.xlu0 %v1456_v17 }
 0xa2d   :  { %1460 = vadd.xlane.f32.xlu0 %v1459_v9 }
 0xa43   :  { %1477 = vrot.lane.b32.xlu0 %v1473_v22, %s2221_s10 }
 0xa47   :  { %1702 = vrot.lane.b32.xlu0 %v1698_v11, %s2221_s10 }
 0xab6   :  { %v1458_v25 = vpop.xlane.xlu0 %1457 }
 0xab7   :  { %v1462_v42 = vmul.f32 0.03125, %v1458_v25 }
 0xab9   :  { %v1464_v43 = vadd.f32 1e-05, %v1462_v42 }
 0xaba   :  { %v1461_v44 = vpop.xlane.xlu0 %1460 }
 0xabb   :  { %2138 = vrsqrt.f32 %v1464_v43  ;;  %v1463_v45 = vmul.f32 0.03125, %v1461_v44 }
 0xabd   :  { %v1465_v24 = vadd.f32 1e-05, %v1463_v45 }
 0xabe   :  { %v1478_v48 = vpop.permute.xlu0 %1477 }
 0xabf   :  { %2140 = vrsqrt.f32 %v1465_v24 }
 0xac2   :  { %v1703_v33 = vpop.permute.xlu0 %1702 }
 0xac5   :  { %v2139_v46 = vpop.eup %2138 }
 0xac6   :  { %v1468_v47 = vmul.f32 %v2139_v46, %v1452_v14 }
 0xac8   :  { %v1474_v49 = vmul.f32 %v1473_v22, %v1468_v47 }
 0xac9   :  { %v2141_v18 = vpop.eup %2140 }
 0xaca   :  { %v1469_v50 = vmul.f32 %v2141_v18, %v1453_v31  ;;  %v1480_v51 = vadd.f32 %v1478_v48, %v1474_v49 }
 0xacc   :  { %v1475_v52 = vmul.f32 %v1473_v22, %v1469_v50  ;;  %1949 = vmatprep.mubr.msk.f32.mxu1 %vm85_vm0, %v1480_v51 }
 0xace   :  { %v1481_v53 = vadd.f32 %v1478_v48, %v1475_v52 }
 0xad0   :  { %1950 = vmatmul.mubr.msk.f32.vlgmr.msra.gmra.mrb[12].mxu1 %vm85_vm0, %v1481_v53 }
 0xba3   :  { %v1951_v58 = vpop.f32.mrb[12].mxu1 }
 0xba4   :  { %v1568_v59 = vadd.f32 %v1951_v58, %v1489_v35  ;;  %v1562_v60 = vpop.f32.mrb[13].mxu1 }
 0xba5   :  { %v1563_v21 = vadd.f32 %v1562_v60, %v1489_v35 }
 0xba6   :  { %v1572_v61 = vmax.f32 %v1568_v59, 0.0 }
 0xba7   :  { %v1571_v20 = vmax.f32 %v1563_v21, 0.0 }
 0xba9   :  { %1968 = vmatprep.mubr.msk.f32.mxu0 %vm1585_vm6, %v1571_v20 }
 0xbaa   :  { %1969 = vmatmul.mubr.msk.f32.vlgmr.msra.gmra.mrb[10].mxu0 %vm1585_vm6, %v1572_v61 }
 0xc7d   :  { %v1970_v0 = vpop.f32.mrb[10].mxu0 }
 0xc7e   :  { %v1658_v1 = vpop.f32.mrb[11].mxu0  ;;  %v1664_v2 = vadd.f32 %v1970_v0, %v1584_v63 }
 0xc7f   :  { %v1659_v3 = vadd.f32 %v1658_v1, %v1584_v63 }
 0xc80   :  { %v1668_v7 = vadd.f32 %v1664_v2, %v1481_v53 }
 0xc81   :  { %v1667_v4 = vadd.f32 %v1659_v3, %v1480_v51 }
 0xc82   :  { %v1672_v8 = vsel %vm85_vm0, %v1668_v7, 0.0 }
 0xc83   :  { %v1669_v6 = vsel %vm85_vm0, %v1667_v4, 0.0 }
 0xc84   :  { %1670 = vadd.xlane.f32.xlu1 %v1669_v6 }
 0xc88   :  { %1673 = vadd.xlane.f32.xlu1 %v1672_v8 }
 0xd11   :  { %v1671_v12 = vpop.xlane.xlu1 %1670 }
 0xd12   :  { %v1675_v31 = vmul.f32 0.03125, %v1671_v12 }
 0xd14   :  { %v1677_v14 = vsub.f32 %v1667_v4, %v1675_v31 }
 0xd15   :  { %v1674_v16 = vpop.xlane.xlu1 %1673 }
 0xd16   :  { %v1676_v17 = vmul.f32 0.03125, %v1674_v16  ;;  %v1679_v19 = vmul.f32 %v1677_v14, %v1677_v14 }
 0xd18   :  { %v1678_v9 = vsub.f32 %v1668_v7, %v1676_v17  ;;  %v1681_v5 = vsel %vm85_vm0, %v1679_v19, 0.0 }
 0xd19   :  { %1682 = vadd.xlane.f32.xlu1 %v1681_v5 }
 0xd1a   :  { %v1680_v22 = vmul.f32 %v1678_v9, %v1678_v9 }
 0xd1c   :  { %v1684_v23 = vsel %vm85_vm0, %v1680_v22, 0.0 }
 0xd1d   :  { %1685 = vadd.xlane.f32.xlu1 %v1684_v23 }
 0xda6   :  { %v1683_v26 = vpop.xlane.xlu1 %1682 }
 0xda7   :  { %v1687_v13 = vmul.f32 0.03125, %v1683_v26 }
 0xda9   :  { %v1689_v27 = vadd.f32 1e-05, %v1687_v13 }
 0xdaa   :  { %v1686_v15 = vpop.xlane.xlu1 %1685 }
 0xdab   :  { %2142 = vrsqrt.f32 %v1689_v27  ;;  %v1688_v28 = vmul.f32 0.03125, %v1686_v15 }
 0xdad   :  { %v1690_v29 = vadd.f32 1e-05, %v1688_v28 }
 0xdaf   :  { %2144 = vrsqrt.f32 %v1690_v29 }
 0xdb5   :  { %v2143_v30 = vpop.eup %2142 }
 0xdb6   :  { %v1693_v32 = vmul.f32 %v2143_v30, %v1677_v14 }
 0xdb8   :  { %v1699_v34 = vmul.f32 %v1698_v11, %v1693_v32 }
 0xdb9   :  { %v2145_v36 = vpop.eup %2144 }
 0xdba   :  { %v1694_v37 = vmul.f32 %v2145_v36, %v1678_v9  ;;  %v1705_v40 = vadd.f32 %v1703_v33, %v1699_v34 }
 0xdbc   :  { %v1700_v41 = vmul.f32 %v1698_v11, %v1694_v37  ;;  %v1708_v39 = vrot.slane %v1705_v40, 4 }
 0xdbe   :  { %v1706_v38 = vadd.f32 %v1703_v33, %v1700_v41  ;;  %1709 = vrot.lane.b32.xlu1 %v1708_v39, %s2228_s6 }
 0xdc0   :  { %1713 = vrot.lane.b32.xlu0 %v1706_v38, %s2229_s14  ;;  %v1716_v25 = vrot.slane %v1706_v38, 4 }
 0xdc4   :  { %1717 = vrot.lane.b32.xlu0 %v1716_v25, %s2221_s10 }
 0xe30   :  { %v1710_v42 = vpop.permute.xlu1 %1709 }
 0xe31   :  { %v1720_v44 = vsel %vm85_vm0, %v1705_v40, %v1710_v42 }
 0xe32   :  { %v1714_v43 = vpop.permute.xlu0 %1713 }
 0xe33   :  { %v1721_v45 = vsel %vm1585_vm6, %v1720_v44, %v1714_v43 }
 0xe36   :  { %v1718_v24 = vpop.permute.xlu0 %1717 }
 0xe37   :  { %v1723_v46 = vsel %vm1722_vm7, %v1721_v45, %v1718_v24 }
 0xe38   :  { %1724 = vst [vmem:[%s2591_s8] sm:$0xf] %v1723_v46 }
 0xe39   :  { %1729 = vsyncpa [#allocation3], 1 }
 0xe3a   :  { %1730 = vsyncpa [#allocation5], 1 }

</bundles_post_ra>
